<compile_context>
chip_gen: v5e
topology: v5e:2x2
jax: 0.10.0
libtpu: 0.0.40
codegen_flags: <defaults>
</compile_context>

<pallas_src>
import functools

import jax
import jax.numpy as jnp
from jax.experimental import pallas as pl
from jax.experimental.pallas import tpu as pltpu

_LANE = 128                  # TPU lane width
_MAX_COLS = 1024             # max lane-dense slab width (multiple of 128)
_MAX_BLOCK_ELEMS = 1 << 20   # ~1M elems per block (4 MiB at f32)
_SMALL_BYTES = 1 << 20       # below this, plain XLA add beats a Pallas launch


def _round_up(n, m):
    return ((n + m - 1) // m) * m


def _sublane(*dtypes):
    # dtype-specific sublane packing: f32 -> 8, bf16/f16 -> 16, int8/fp8 -> 32
    min_itemsize = min(jnp.dtype(d).itemsize for d in dtypes)
    return max(8, 32 // max(1, min_itemsize))


def _pick_cols(total):
    # Largest power-of-two multiple of 128 (<= _MAX_COLS) dividing `total`,
    # so the reshape is free and every store is an unmasked lane-dense vst.
    c = _MAX_COLS
    while c > _LANE and total % c != 0:
        c //= 2
    return c


def _daf_kernel(x_ref, r_ref, o_ref):
    # Pure VPU elementwise add on one (block_rows, cols) tile; the dtype
    # promotion (if any) happens here so HBM only carries the narrow inputs.
    dt = o_ref.dtype
    o_ref[...] = x_ref[...].astype(dt) + r_ref[...].astype(dt)


@functools.partial(jax.jit, static_argnames=("force_pallas",))
def daf(x, residual, force_pallas=False):
    """DirectAddFuse: x + residual, computed with a tiled Pallas TPU kernel."""
    assert x.shape == residual.shape, "DAF requires matching shapes"
    orig_shape = x.shape
    out_dtype = jnp.result_type(x.dtype, residual.dtype)

    total = x.size
    nbytes = total * jnp.dtype(out_dtype).itemsize
    # Fallback: tiny tensors (launch overhead dominates) or element counts
    # that are not a multiple of the 128-lane width (would need a pad pass).
    if total == 0 or total % _LANE != 0 or (nbytes < _SMALL_BYTES and not force_pallas):
        return x.astype(out_dtype) + residual.astype(out_dtype)

    cols = _pick_cols(total)
    rows = total // cols
    sub = _sublane(x.dtype, residual.dtype, out_dtype)

    # Contiguous flatten/reshape is free; inputs stay in their original dtypes.
    x2 = x.reshape(rows, cols)
    r2 = residual.reshape(rows, cols)

    if rows <= sub:
        block_rows = rows  # single full-extent block (allowed by the layout rule)
    else:
        # Aim for >= 2 blocks so both v7x TensorCores get work; cap the block
        # size so 3 arrays x 2 pipeline buffers fit VMEM on every generation.
        max_rows = max(sub, (_MAX_BLOCK_ELEMS // cols) // sub * sub)
        block_rows = min(max_rows, _round_up(pl.cdiv(rows, 2), sub))

    grid = (pl.cdiv(rows, block_rows),)  # ragged last block is masked by Pallas

    blk = pl.BlockSpec((block_rows, cols), lambda i: (i, 0))

    out2 = pl.pallas_call(
        _daf_kernel,
        out_shape=jax.ShapeDtypeStruct((rows, cols), out_dtype),
        grid_spec=pltpu.PrefetchScalarGridSpec(
            num_scalar_prefetch=0,
            grid=grid,
            in_specs=[blk, blk],
            out_specs=blk,
        ),
        compiler_params=pltpu.CompilerParams(
            # TODO(synk): on v7x, verify via a trace that both TensorCores get
            # blocks; if serialized, switch to CORE_PARALLEL on a leading
            # grid axis of size 2.
            dimension_semantics=("parallel",),
            vmem_limit_bytes=32 * 1024 * 1024,  # 24 MiB used worst-case, fits all chips
        ),
    )(x2, r2)

    return out2.reshape(orig_shape)


if __name__ == "__main__":
    # Small NCHW feature maps, consistent with the UNet module.
    N, C, H, W = 2, 4, 16, 16
    key = jax.random.PRNGKey(0)
    kx, kr = jax.random.split(key, 2)
    x_in = jax.random.normal(kx, (N, C, H, W), jnp.float32)
    res_in = jax.random.normal(kr, (N, C, H, W), jnp.float32)

    # 1) Pallas kernel path (forced, since the demo tensor is tiny).
    out = daf(x_in, res_in, force_pallas=True)
    jax.block_until_ready(out)
    ref = x_in + res_in
    assert out.shape == (N, C, H, W)
    assert out.dtype == ref.dtype
    assert jnp.allclose(out, ref, atol=1e-6, rtol=1e-6)

    # 2) Mixed-dtype inputs: promotion happens inside the kernel.
    res_bf16 = res_in.astype(jnp.bfloat16)
    out_mixed = daf(x_in, res_bf16, force_pallas=True)
    jax.block_until_ready(out_mixed)
    ref_mixed = x_in + res_bf16.astype(jnp.float32)
    assert out_mixed.dtype == jnp.float32
    assert jnp.allclose(out_mixed, ref_mixed, atol=1e-6, rtol=1e-6)

    # 3) Default small-input fallback (no Pallas launch) stays correct.
    out_small = daf(x_in, res_in)
    jax.block_until_ready(out_small)
    assert jnp.allclose(out_small, ref, atol=1e-6, rtol=1e-6)

    print("KERNEL_OK")
</pallas_src>

<mosaic_0001>
module attributes {stable_mosaic.version = 11 : i64} {
  func.func @_daf_kernel(%arg0: i32, %arg1: memref<2x1024xf32, #tpu.memory_space<vmem>>, %arg2: memref<2x1024xf32, #tpu.memory_space<vmem>>, %arg3: memref<2x1024xf32, #tpu.memory_space<vmem>>) attributes {dimension_semantics = [#tpu.dimension_semantics<parallel>], iteration_bounds = array<i64: 1>, scalar_prefetch = 0 : i64, scratch_operands = 0 : i64, tpu.core_type = #tpu.core_type<tc>, window_params = [{transform_indices = @transform_0, window_bounds = array<i64: 2, 1024>}, {transform_indices = @transform_1, window_bounds = array<i64: 2, 1024>}, {transform_indices = @transform_2, window_bounds = array<i64: 2, 1024>}]} {
    %c0 = arith.constant 0 : index
    %c0_0 = arith.constant 0 : index
    %0 = vector.load %arg1[%c0, %c0_0] : memref<2x1024xf32, #tpu.memory_space<vmem>>, vector<2x1024xf32>
    %c0_1 = arith.constant 0 : index
    %c0_2 = arith.constant 0 : index
    %1 = vector.load %arg2[%c0_1, %c0_2] : memref<2x1024xf32, #tpu.memory_space<vmem>>, vector<2x1024xf32>
    %2 = arith.addf %0, %1 : vector<2x1024xf32>
    %c0_3 = arith.constant 0 : index
    %c0_4 = arith.constant 0 : index
    %3 = vector.load %arg3[%c0_3, %c0_4] : memref<2x1024xf32, #tpu.memory_space<vmem>>, vector<2x1024xf32>
    tpu.vector_store %arg3[%c0_3, %c0_4], %2 {strides = array<i32>} : memref<2x1024xf32, #tpu.memory_space<vmem>>, vector<2x1024xf32>,
    return
  }
  func.func @transform_0(%arg0: i32) -> (i32, i32) {
    %c0_i32 = arith.constant 0 : i32
    %c0_i32_0 = arith.constant 0 : i32
    return %arg0, %c0_i32 : i32, i32
  }
  func.func @transform_1(%arg0: i32) -> (i32, i32) {
    %c0_i32 = arith.constant 0 : i32
    %c0_i32_0 = arith.constant 0 : i32
    return %arg0, %c0_i32 : i32, i32
  }
  func.func @transform_2(%arg0: i32) -> (i32, i32) {
    %c0_i32 = arith.constant 0 : i32
    %c0_i32_0 = arith.constant 0 : i32
    return %arg0, %c0_i32 : i32, i32
  }
}

</mosaic_0001>

<bundles_post_ra>
// kernel: daf.1
= control target key start
LH: loop header
LB: loop body
LE: loop exit
PB: predicated region body
PF: predicated region fallthrough
CT: control target
= control target key end

     0   :  { %s56_s0 = inlined_call_operand.vmem [shape: f32[2,1024], index: 0, kind: input, shape index: {}]   ;;  %s57_s1 = inlined_call_operand.vmem [shape: f32[2,1024], index: 1, kind: input, shape index: {}]   ;;  %s58_s2 = inlined_call_operand.vmem [shape: f32[2,1024], index: 2, kind: output, shape index: {}]  }
   0x1   :  { %v11_v0 = vld [vmem:[%s56_s0] sm:$0xff]  ;;  %v12_v2 = vld [vmem:[%s56_s0 + $0x8] sm:$0xff] }
   0x2   :  { %v13_v1 = vld [vmem:[%s57_s1] sm:$0xff]  ;;  %v14_v4 = vld [vmem:[%s57_s1 + $0x8] sm:$0xff] }
   0x3   :  { %v15_v3 = vadd.f32 %v13_v1, %v11_v0  ;;  %v16_v5 = vadd.f32 %v14_v4, %v12_v2 }
   0x5   :  { %17 = vst [vmem:[%s58_s2] sm:$0xff] %v15_v3 }
   0x6   :  { %18 = vst [vmem:[%s58_s2 + $0x8] sm:$0xff] %v16_v5 }

</bundles_post_ra>
